<compile_context>
chip_gen: v7x
topology: tpu7x:2x2x1
jax: 0.10.0
libtpu: 0.0.40
codegen_flags: <defaults>
</compile_context>

<pallas_src>
import functools

import numpy as np
import jax
import jax.numpy as jnp
from jax import lax
from jax.experimental import pallas as pl
from jax.experimental.pallas import tpu as pltpu

BN_EPS = 1e-5


# -----------------------------------------------------------------------------------
# Fused ConvBlock kernel: Conv1d (one MXU contraction) + BN(train) + ReLU + re-pad
# -----------------------------------------------------------------------------------
def _make_convblock_kernel(n, kp, c_eff, l_out, lp, rp):
    """Kernel factory closing over the static conv geometry.

    x_ref : (N, C_eff, L_in)       bf16, full activation (VMEM-resident, constant block)
    w_ref : (co_t, K'*C_eff)       bf16, taps flattened into the contraction dim
    g_ref : (co_t, 1)              f32 BN gamma
    b_ref : (co_t, 1)              f32 BN beta
    o_ref : (N, co_t, orig_len)    f32 output tile (NCL, re-pad fused in)
    slab  : (K'*C_eff, N*L_out)    bf16 VMEM scratch (shifted-activation slab)
    """
    w_cols = n * l_out
    inv_m = 1.0 / float(w_cols)

    def kernel(x_ref, w_ref, g_ref, b_ref, o_ref, slab_ref):
        co_t = o_ref.shape[1]

        # ---- build the shifted-activation slab once in VMEM (bf16) -------------------
        #   slab[q*C_eff + c, b*L_out + t] = x[b, c, t + q]
        for q in range(kp):
            for b in range(n):
                slab_ref[q * c_eff:(q + 1) * c_eff, b * l_out:(b + 1) * l_out] = \
                    x_ref[b, :, q:q + l_out]

        # ---- one MXU contraction: taps and batch both folded in ----------------------
        res = jnp.dot(w_ref[...], slab_ref[...],
                      preferred_element_type=jnp.float32)           # (co_t, N*L_out) f32
        # NOTE: no conv-bias add — training-mode BN cancels it exactly.

        # ---- BatchNorm1d batch statistics (exact per channel, centered variance) -----
        mean = jnp.sum(res, axis=1, keepdims=True) * inv_m          # (co_t, 1)
        d = res - mean
        var = jnp.sum(d * d, axis=1, keepdims=True) * inv_m
        inv_std = lax.rsqrt(var + BN_EPS)

        scale = g_ref[...] * inv_std                                 # (co_t, 1)
        shift = b_ref[...] - mean * scale
        y = jnp.maximum(res * scale + shift, 0.0)                    # (co_t, N*L_out)

        # ---- write NCL output with the symmetric zero re-pad fused in -----------------
        for b in range(n):
            if lp > 0:
                o_ref[b, :, 0:lp] = jnp.zeros((co_t, lp), jnp.float32)
            o_ref[b, :, lp:lp + l_out] = y[:, b * l_out:(b + 1) * l_out]
            if rp > 0:
                o_ref[b, :, lp + l_out:lp + l_out + rp] = jnp.zeros((co_t, rp), jnp.float32)

    return kernel


def _pick_cout_tile(c_out, w_cols):
    """Largest multiple-of-8 divisor of c_out such that the f32 result tile
    (co_t x w_cols) stays ~<= 32 vregs, preferring a grid of >= 2 tiles so both
    TensorCores of a v7x chip get work."""
    if c_out % 8 != 0:
        return c_out
    lane_groups = max(1, -(-w_cols // 128))
    max_rows = max(8, (32 // lane_groups) * 8)
    divs = [d for d in range(8, c_out + 1, 8) if c_out % d == 0]
    pref = [d for d in divs if d <= max_rows and c_out // d >= 2]
    if pref:
        return max(pref)
    ok = [d for d in divs if d <= max_rows]
    if ok:
        return max(ok)
    return divs[0]


def conv_block_pallas(x, params, stride, padding):
    """ConvBlock forward: Conv1d(stride, padding) -> BN(train) -> ReLU -> re-pad."""
    weight = params["weight"].astype(jnp.float32)
    gamma = params["gamma"].astype(jnp.float32).reshape(-1, 1)
    beta = params["beta"].astype(jnp.float32).reshape(-1, 1)
    # params["bias"] is intentionally unused: training-mode BatchNorm subtracts the
    # per-channel mean, which cancels the Conv1d bias exactly.

    n, c_in, orig_len = x.shape
    c_out, _, k = weight.shape
    s = int(stride)
    padding = int(padding)
    l_pad = orig_len + 2 * padding
    l_out = (l_pad - k) // s + 1

    # ---- glue: fold the stride into channels (polyphase) -> stride-1 problem ---------
    kp = -(-k // s)                      # ceil(k / s)
    c_eff = c_in * s
    l_in = l_out + kp - 1

    x_pad = x.astype(jnp.float32)
    if padding:
        x_pad = jnp.pad(x_pad, ((0, 0), (0, 0), (padding, padding)))
    if s == 1:
        x_eff = x_pad[:, :, :l_in]
        w_eff = jnp.transpose(weight, (2, 0, 1))              # (K, C_out, C_in)
    else:
        phases = []
        for p in range(s):
            xs = x_pad[:, :, p::s]
            have = xs.shape[2]
            if have < l_in:
                xs = jnp.pad(xs, ((0, 0), (0, 0), (0, l_in - have)))
            else:
                xs = xs[:, :, :l_in]
            phases.append(xs)
        x_eff = jnp.concatenate(phases, axis=1)               # (N, C_in*s, L_in)

        w_eff = jnp.zeros((kp, c_out, c_eff), jnp.float32)
        for q in range(kp):
            for p in range(s):
                kk = q * s + p
                if kk < k:
                    w_eff = w_eff.at[q, :, p * c_in:(p + 1) * c_in].set(weight[:, :, kk])

    # Flatten the taps into the MXU contraction dim; bf16 operands, f32 accumulate.
    w_flat = jnp.transpose(w_eff, (1, 0, 2)).reshape(c_out, kp * c_eff).astype(jnp.bfloat16)
    x_eff = x_eff.astype(jnp.bfloat16)

    lp = int(np.floor((orig_len - l_out) / 2))
    rp = int(np.ceil((orig_len - l_out) / 2))

    w_cols = n * l_out
    co_t = _pick_cout_tile(c_out, w_cols)
    grid = (c_out // co_t,)

    kernel = _make_convblock_kernel(n, kp, c_eff, l_out, lp, rp)

    cost = pl.CostEstimate(
        flops=2 * c_out * kp * c_eff * w_cols,
        transcendentals=0,
        bytes_accessed=2 * (x_eff.size + w_flat.size) + 4 * (2 * c_out + n * c_out * orig_len),
    )

    return pl.pallas_call(
        kernel,
        out_shape=jax.ShapeDtypeStruct((n, c_out, orig_len), jnp.float32),
        grid=grid,
        in_specs=[
            # Full activation, VMEM-resident across all channel tiles (constant block).
            pl.BlockSpec((n, c_eff, l_in), lambda i: (0, 0, 0)),
            # Per-tile slice of the flattened weights / BN affine params.
            pl.BlockSpec((co_t, kp * c_eff), lambda i: (i, 0)),
            pl.BlockSpec((co_t, 1), lambda i: (i, 0)),
            pl.BlockSpec((co_t, 1), lambda i: (i, 0)),
        ],
        out_specs=pl.BlockSpec((n, co_t, orig_len), lambda i: (0, i, 0)),
        scratch_shapes=[pltpu.VMEM((kp * c_eff, w_cols), jnp.bfloat16)],
        compiler_params=pltpu.CompilerParams(
            dimension_semantics=("parallel",),
            vmem_limit_bytes=8 * 1024 * 1024,
        ),
        cost_estimate=cost,
    )(x_eff, w_flat, gamma, beta)


# -----------------------------------------------------------------------------------
# Pure-JAX reference ConvBlock (mirrors the PyTorch forward, training-mode BN, f32)
# -----------------------------------------------------------------------------------
def conv_block_reference(x, params, stride, padding):
    y = lax.conv_general_dilated(
        x.astype(jnp.float32), params["weight"].astype(jnp.float32),
        window_strides=(stride,), padding=[(padding, padding)],
        dimension_numbers=("NCH", "OIH", "NCH"), precision=lax.Precision.HIGHEST)
    y = y + params["bias"][None, :, None]
    mean = jnp.mean(y, axis=(0, 2), keepdims=True)
    var = jnp.mean((y - mean) ** 2, axis=(0, 2), keepdims=True)
    y = (y - mean) * lax.rsqrt(var + BN_EPS)
    y = y * params["gamma"][None, :, None] + params["beta"][None, :, None]
    y = jnp.maximum(y, 0.0)
    orig_len, l_out = x.shape[2], y.shape[2]
    lp = int(np.floor((orig_len - l_out) / 2))
    rp = int(np.ceil((orig_len - l_out) / 2))
    if lp or rp:
        y = jnp.pad(y, ((0, 0), (0, 0), (lp, rp)))
    return y


# -----------------------------------------------------------------------------------
# Plain-JAX glue for the rest of DownstreamInception
# -----------------------------------------------------------------------------------
def _maxpool1d_k3s2p1(x):
    return lax.reduce_window(x, -jnp.inf, lax.max,
                             window_dimensions=(1, 1, 3), window_strides=(1, 1, 2),
                             padding=((0, 0), (0, 0), (1, 1)))


def _maxpool2d_k3s1p1(x):
    # nn.MaxPool2d(3, stride=1, padding=1) applied to a 3-D (N, C, L) tensor pools
    # jointly over the (channel, length) plane of each batch element.
    return lax.reduce_window(x, -jnp.inf, lax.max,
                             window_dimensions=(1, 3, 3), window_strides=(1, 1, 1),
                             padding=((0, 0), (1, 1), (1, 1)))


def _avgpool1d_k5s1(x):
    s = lax.reduce_window(x, 0.0, lax.add,
                          window_dimensions=(1, 1, 5), window_strides=(1, 1, 1),
                          padding=((0, 0), (0, 0), (0, 0)))
    return s / 5.0


def _fuse_reducer_params(p1, p2, p3):
    # The three 1x1 reducers of an Inception module share the same input; BN is
    # per-channel, so concatenating along C_out is mathematically identical.
    return dict(
        weight=jnp.concatenate([p1["weight"], p2["weight"], p3["weight"]], axis=0),
        bias=jnp.concatenate([p1["bias"], p2["bias"], p3["bias"]], axis=0),
        gamma=jnp.concatenate([p1["gamma"], p2["gamma"], p3["gamma"]], axis=0),
        beta=jnp.concatenate([p1["beta"], p2["beta"], p3["beta"]], axis=0),
    )


def _inception_forward(x, p, block_fn, fuse_reducers):
    if fuse_reducers:
        fused = _fuse_reducer_params(p["b1"], p["b2a"], p["b3a"])
        y = block_fn(x, fused, 1, 0)
        c1 = p["b1"]["gamma"].shape[0]
        c2 = p["b2a"]["gamma"].shape[0]
        br1 = y[:, :c1]
        red3 = y[:, c1:c1 + c2]
        red5 = y[:, c1 + c2:]
    else:
        br1 = block_fn(x, p["b1"], 1, 0)
        red3 = block_fn(x, p["b2a"], 1, 0)
        red5 = block_fn(x, p["b3a"], 1, 0)
    br2 = block_fn(red3, p["b2b"], 1, 1)
    br3 = block_fn(red5, p["b3b"], 1, 2)
    br4 = block_fn(_maxpool2d_k3s1p1(x), p["b4"], 1, 0)
    return jnp.concatenate([br1, br2, br3, br4], axis=1)


def downstream_inception_forward(x, params, block_fn, fuse_reducers=True):
    out = block_fn(x, params["conv1"], 2, 3)
    out = _maxpool1d_k3s2p1(out)
    out = block_fn(out, params["conv2"], 1, 1)
    out = _maxpool1d_k3s2p1(out)
    out = _inception_forward(out, params["i3a"], block_fn, fuse_reducers)
    out = _inception_forward(out, params["i3b"], block_fn, fuse_reducers)
    out = _maxpool1d_k3s2p1(out)
    out = _inception_forward(out, params["i4a"], block_fn, fuse_reducers)
    out = _inception_forward(out, params["i4b"], block_fn, fuse_reducers)
    out = _avgpool1d_k5s1(out)
    out = out.reshape(out.shape[0], -1)
    # TODO(synk): nn.Dropout with p > 0 (training-mode mask) is not implemented; the
    # demo constructs the module with dropout=0.0, which is exactly the identity.
    out = out @ params["fc_w"].T + params["fc_b"]
    return jax.nn.sigmoid(out)


# -----------------------------------------------------------------------------------
# Deterministic synthetic parameters (shapes match the PyTorch module, scale=1)
# -----------------------------------------------------------------------------------
def _init_convblock(key, c_in, c_out, k):
    kw, kb, kg, kbe = jax.random.split(key, 4)
    fan = 1.0 / np.sqrt(c_in * k)
    return dict(
        weight=fan * jax.random.normal(kw, (c_out, c_in, k), jnp.float32),
        bias=fan * jax.random.normal(kb, (c_out,), jnp.float32),
        gamma=1.0 + 0.1 * jax.random.normal(kg, (c_out,), jnp.float32),
        beta=0.1 * jax.random.normal(kbe, (c_out,), jnp.float32),
    )


def _init_inception(key, c_in, out1, red3, out3, red5, out5, out_pool):
    ks = jax.random.split(key, 6)
    return dict(
        b1=_init_convblock(ks[0], c_in, out1, 1),
        b2a=_init_convblock(ks[1], c_in, red3, 1),
        b2b=_init_convblock(ks[2], red3, out3, 3),
        b3a=_init_convblock(ks[3], c_in, red5, 1),
        b3b=_init_convblock(ks[4], red5, out5, 5),
        b4=_init_convblock(ks[5], c_in, out_pool, 1),
    )


def init_downstream_inception(key, num_inputs=12, scale=1):
    ks = jax.random.split(key, 8)
    return dict(
        conv1=_init_convblock(ks[0], num_inputs, 64, 7),
        conv2=_init_convblock(ks[1], 64, 128 * scale, 3),
        i3a=_init_inception(ks[2], 128 * scale, 64 * scale, 96, 128 * scale,
                            16, 32 * scale, 32 * scale),
        i3b=_init_inception(ks[3], 256 * scale, 128 * scale, 128, 192 * scale,
                            32, 96 * scale, 64 * scale),
        i4a=_init_inception(ks[4], 480 * scale, 192 * scale, 96, 208 * scale,
                            16, 48 * scale, 64 * scale),
        i4b=_init_inception(ks[5], 512 * scale, 32, 112, 32, 24, 64, 32),
        fc_w=(1.0 / np.sqrt(8480)) * jax.random.normal(ks[6], (1, 8480), jnp.float32),
        fc_b=0.01 * jax.random.normal(ks[7], (1,), jnp.float32),
    )


# -----------------------------------------------------------------------------------
if __name__ == "__main__":
    key = jax.random.PRNGKey(0)
    k_params, k_x = jax.random.split(key)

    # L=449 is the smallest input length consistent with the module's fc=Linear(8480, 1):
    # three MaxPool1d(3,2,1) halvings -> 57, AvgPool1d(5,1) -> 53, 160 ch * 53 = 8480.
    N, C_IN, L = 2, 12, 449
    x = jax.random.normal(k_x, (N, C_IN, L), dtype=jnp.float32)
    params = init_downstream_inception(k_params, num_inputs=C_IN, scale=1)

    # --- unit checks: fused Pallas ConvBlock (bf16 MXU operands) vs f32 reference -----
    for blk, stride, pad, cin, lchk in (
        ("conv1", 2, 3, C_IN, 64),     # k=7, stride 2 -> polyphase path
        ("conv2", 1, 1, 64, 56),       # k=3, "same" padding
    ):
        xt = jax.random.normal(jax.random.PRNGKey(1), (N, cin, lchk), jnp.float32)
        got = jax.block_until_ready(conv_block_pallas(xt, params[blk], stride, pad))
        want = jax.block_until_ready(conv_block_reference(xt, params[blk], stride, pad))
        np.testing.assert_allclose(np.asarray(got), np.asarray(want), rtol=2e-2, atol=2e-2)

    # k=5 branch (i3a branch3 second conv).
    xt = jax.random.normal(jax.random.PRNGKey(2), (N, 16, 60), jnp.float32)
    got = jax.block_until_ready(conv_block_pallas(xt, params["i3a"]["b3b"], 1, 2))
    want = jax.block_until_ready(conv_block_reference(xt, params["i3a"]["b3b"], 1, 2))
    np.testing.assert_allclose(np.asarray(got), np.asarray(want), rtol=2e-2, atol=2e-2)

    # --- full DownstreamInception forward: Pallas (fused reducers) vs pure-JAX f32 ----
    model_pallas = jax.jit(functools.partial(downstream_inception_forward,
                                             block_fn=conv_block_pallas,
                                             fuse_reducers=True))
    model_ref = jax.jit(functools.partial(downstream_inception_forward,
                                          block_fn=conv_block_reference,
                                          fuse_reducers=False))

    out = jax.block_until_ready(model_pallas(x, params))
    ref = jax.block_until_ready(model_ref(x, params))

    assert out.shape == (N, 1), out.shape
    np.testing.assert_allclose(np.asarray(out), np.asarray(ref), rtol=5e-2, atol=3e-2)

    print("KERNEL_OK")
</pallas_src>

<mosaic_0001>
module attributes {stable_mosaic.version = 11 : i64} {
  func.func @kernel(%arg0: i32, %arg1: memref<2x24x35xbf16, #tpu.memory_space<vmem>>, %arg2: memref<32x96xbf16, #tpu.memory_space<vmem>>, %arg3: memref<32x1xf32, #tpu.memory_space<vmem>>, %arg4: memref<32x1xf32, #tpu.memory_space<vmem>>, %arg5: memref<2x32x64xf32, #tpu.memory_space<vmem>>, %arg6: memref<96x64xbf16, #tpu.memory_space<vmem>>) attributes {dimension_semantics = [#tpu.dimension_semantics<parallel>], iteration_bounds = array<i64: 2>, scalar_prefetch = 0 : i64, scratch_operands = 1 : i64, tpu.core_type = #tpu.core_type<tc>, window_params = [{pipeline_mode = #tpu.pipeline_mode<synchronous>, transform_indices = @transform_0, window_bounds = array<i64: 2, 24, 35>}, {transform_indices = @transform_1, window_bounds = array<i64: 32, 96>}, {transform_indices = @transform_2, window_bounds = array<i64: 32, 1>}, {transform_indices = @transform_3, window_bounds = array<i64: 32, 1>}, {transform_indices = @transform_4, window_bounds = array<i64: 2, 32, 64>}]} {
    %c0 = arith.constant 0 : index
    %c0_0 = arith.constant 0 : index
    %c0_1 = arith.constant 0 : index
    %0 = vector.load %arg1[%c0, %c0_0, %c0_1] : memref<2x24x35xbf16, #tpu.memory_space<vmem>>, vector<1x24x32xbf16>
    %1 = vector.shape_cast %0 : vector<1x24x32xbf16> to vector<24x32xbf16>
    %c0_2 = arith.constant 0 : index
    %c0_3 = arith.constant 0 : index
    %2 = vector.load %arg6[%c0_2, %c0_3] : memref<96x64xbf16, #tpu.memory_space<vmem>>, vector<24x32xbf16>
    tpu.vector_store %arg6[%c0_2, %c0_3], %1 {strides = array<i32>} : memref<96x64xbf16, #tpu.memory_space<vmem>>, vector<24x32xbf16>,
    %c1 = arith.constant 1 : index
    %c0_4 = arith.constant 0 : index
    %c0_5 = arith.constant 0 : index
    %3 = vector.load %arg1[%c1, %c0_4, %c0_5] : memref<2x24x35xbf16, #tpu.memory_space<vmem>>, vector<1x24x32xbf16>
    %4 = vector.shape_cast %3 : vector<1x24x32xbf16> to vector<24x32xbf16>
    %c0_6 = arith.constant 0 : index
    %c32 = arith.constant 32 : index
    %5 = vector.load %arg6[%c0_6, %c32] : memref<96x64xbf16, #tpu.memory_space<vmem>>, vector<24x32xbf16>
    tpu.vector_store %arg6[%c0_6, %c32], %4 {strides = array<i32>} : memref<96x64xbf16, #tpu.memory_space<vmem>>, vector<24x32xbf16>,
    %c0_7 = arith.constant 0 : index
    %c0_8 = arith.constant 0 : index
    %c1_9 = arith.constant 1 : index
    %6 = vector.load %arg1[%c0_7, %c0_8, %c1_9] : memref<2x24x35xbf16, #tpu.memory_space<vmem>>, vector<1x24x32xbf16>
    %7 = vector.shape_cast %6 : vector<1x24x32xbf16> to vector<24x32xbf16>
    %c24 = arith.constant 24 : index
    %c0_10 = arith.constant 0 : index
    %8 = vector.load %arg6[%c24, %c0_10] : memref<96x64xbf16, #tpu.memory_space<vmem>>, vector<24x32xbf16>
    tpu.vector_store %arg6[%c24, %c0_10], %7 {strides = array<i32>} : memref<96x64xbf16, #tpu.memory_space<vmem>>, vector<24x32xbf16>,
    %c1_11 = arith.constant 1 : index
    %c0_12 = arith.constant 0 : index
    %c1_13 = arith.constant 1 : index
    %9 = vector.load %arg1[%c1_11, %c0_12, %c1_13] : memref<2x24x35xbf16, #tpu.memory_space<vmem>>, vector<1x24x32xbf16>
    %10 = vector.shape_cast %9 : vector<1x24x32xbf16> to vector<24x32xbf16>
    %c24_14 = arith.constant 24 : index
    %c32_15 = arith.constant 32 : index
    %11 = vector.load %arg6[%c24_14, %c32_15] : memref<96x64xbf16, #tpu.memory_space<vmem>>, vector<24x32xbf16>
    tpu.vector_store %arg6[%c24_14, %c32_15], %10 {strides = array<i32>} : memref<96x64xbf16, #tpu.memory_space<vmem>>, vector<24x32xbf16>,
    %c0_16 = arith.constant 0 : index
    %c0_17 = arith.constant 0 : index
    %c2 = arith.constant 2 : index
    %12 = vector.load %arg1[%c0_16, %c0_17, %c2] : memref<2x24x35xbf16, #tpu.memory_space<vmem>>, vector<1x24x32xbf16>
    %13 = vector.shape_cast %12 : vector<1x24x32xbf16> to vector<24x32xbf16>
    %c48 = arith.constant 48 : index
    %c0_18 = arith.constant 0 : index
    %14 = vector.load %arg6[%c48, %c0_18] : memref<96x64xbf16, #tpu.memory_space<vmem>>, vector<24x32xbf16>
    tpu.vector_store %arg6[%c48, %c0_18], %13 {strides = array<i32>} : memref<96x64xbf16, #tpu.memory_space<vmem>>, vector<24x32xbf16>,
    %c1_19 = arith.constant 1 : index
    %c0_20 = arith.constant 0 : index
    %c2_21 = arith.constant 2 : index
    %15 = vector.load %arg1[%c1_19, %c0_20, %c2_21] : memref<2x24x35xbf16, #tpu.memory_space<vmem>>, vector<1x24x32xbf16>
    %16 = vector.shape_cast %15 : vector<1x24x32xbf16> to vector<24x32xbf16>
    %c48_22 = arith.constant 48 : index
    %c32_23 = arith.constant 32 : index
    %17 = vector.load %arg6[%c48_22, %c32_23] : memref<96x64xbf16, #tpu.memory_space<vmem>>, vector<24x32xbf16>
    tpu.vector_store %arg6[%c48_22, %c32_23], %16 {strides = array<i32>} : memref<96x64xbf16, #tpu.memory_space<vmem>>, vector<24x32xbf16>,
    %c0_24 = arith.constant 0 : index
    %c0_25 = arith.constant 0 : index
    %c3 = arith.constant 3 : index
    %18 = vector.load %arg1[%c0_24, %c0_25, %c3] : memref<2x24x35xbf16, #tpu.memory_space<vmem>>, vector<1x24x32xbf16>
    %19 = vector.shape_cast %18 : vector<1x24x32xbf16> to vector<24x32xbf16>
    %c72 = arith.constant 72 : index
    %c0_26 = arith.constant 0 : index
    %20 = vector.load %arg6[%c72, %c0_26] : memref<96x64xbf16, #tpu.memory_space<vmem>>, vector<24x32xbf16>
    tpu.vector_store %arg6[%c72, %c0_26], %19 {strides = array<i32>} : memref<96x64xbf16, #tpu.memory_space<vmem>>, vector<24x32xbf16>,
    %c1_27 = arith.constant 1 : index
    %c0_28 = arith.constant 0 : index
    %c3_29 = arith.constant 3 : index
    %21 = vector.load %arg1[%c1_27, %c0_28, %c3_29] : memref<2x24x35xbf16, #tpu.memory_space<vmem>>, vector<1x24x32xbf16>
    %22 = vector.shape_cast %21 : vector<1x24x32xbf16> to vector<24x32xbf16>
    %c72_30 = arith.constant 72 : index
    %c32_31 = arith.constant 32 : index
    %23 = vector.load %arg6[%c72_30, %c32_31] : memref<96x64xbf16, #tpu.memory_space<vmem>>, vector<24x32xbf16>
    tpu.vector_store %arg6[%c72_30, %c32_31], %22 {strides = array<i32>} : memref<96x64xbf16, #tpu.memory_space<vmem>>, vector<24x32xbf16>,
    %c0_32 = arith.constant 0 : index
    %c0_33 = arith.constant 0 : index
    %24 = vector.load %arg2[%c0_32, %c0_33] : memref<32x96xbf16, #tpu.memory_space<vmem>>, vector<32x96xbf16>
    %c0_34 = arith.constant 0 : index
    %c0_35 = arith.constant 0 : index
    %25 = vector.load %arg6[%c0_34, %c0_35] : memref<96x64xbf16, #tpu.memory_space<vmem>>, vector<96x64xbf16>
    %cst = arith.constant dense<0.000000e+00> : vector<32x64xf32>
    %26 = tpu.matmul %24, %25, %cst {dimension_numbers = #tpu.dot_dimension_numbers<[1], [0], [0], [1], [0, 0, 1, 1], [], []>} : vector<32x96xbf16>, vector<96x64xbf16>, vector<32x64xf32> -> vector<32x64xf32>
    %cst_36 = arith.constant dense<0.000000e+00> : vector<32xf32>
    %27 = vector.multi_reduction <add>, %26, %cst_36 [1] : vector<32x64xf32> to vector<32xf32>
    %28 = vector.shape_cast %27 : vector<32xf32> to vector<32x1xf32>
    %cst_37 = arith.constant 1.562500e-02 : f32
    %29 = vector.broadcast %cst_37 : f32 to vector<32x1xf32>
    %30 = arith.mulf %28, %29 : vector<32x1xf32>
    %31 = vector.broadcast %30 : vector<32x1xf32> to vector<32x64xf32>
    %32 = arith.subf %26, %31 : vector<32x64xf32>
    %33 = arith.mulf %32, %32 : vector<32x64xf32>
    %cst_38 = arith.constant dense<0.000000e+00> : vector<32xf32>
    %34 = vector.multi_reduction <add>, %33, %cst_38 [1] : vector<32x64xf32> to vector<32xf32>
    %35 = vector.shape_cast %34 : vector<32xf32> to vector<32x1xf32>
    %cst_39 = arith.constant 1.562500e-02 : f32
    %36 = vector.broadcast %cst_39 : f32 to vector<32x1xf32>
    %37 = arith.mulf %35, %36 : vector<32x1xf32>
    %cst_40 = arith.constant 9.99999974E-6 : f32
    %38 = vector.broadcast %cst_40 : f32 to vector<32x1xf32>
    %39 = arith.addf %37, %38 : vector<32x1xf32>
    %40 = math.rsqrt %39 : vector<32x1xf32>
    %c0_41 = arith.constant 0 : index
    %c0_42 = arith.constant 0 : index
    %41 = vector.load %arg3[%c0_41, %c0_42] : memref<32x1xf32, #tpu.memory_space<vmem>>, vector<32x1xf32>
    %42 = arith.mulf %41, %40 : vector<32x1xf32>
    %c0_43 = arith.constant 0 : index
    %c0_44 = arith.constant 0 : index
    %43 = vector.load %arg4[%c0_43, %c0_44] : memref<32x1xf32, #tpu.memory_space<vmem>>, vector<32x1xf32>
    %44 = arith.mulf %30, %42 : vector<32x1xf32>
    %45 = arith.subf %43, %44 : vector<32x1xf32>
    %46 = vector.broadcast %42 : vector<32x1xf32> to vector<32x64xf32>
    %47 = arith.mulf %26, %46 : vector<32x64xf32>
    %48 = vector.broadcast %45 : vector<32x1xf32> to vector<32x64xf32>
    %49 = arith.addf %47, %48 : vector<32x64xf32>
    %cst_45 = arith.constant 0.000000e+00 : f32
    %50 = vector.broadcast %cst_45 : f32 to vector<32x64xf32>
    %51 = arith.maximumf %49, %50 : vector<32x64xf32>
    %cst_46 = arith.constant 0.000000e+00 : f32
    %52 = vector.broadcast %cst_46 : f32 to vector<32x16xf32>
    %c0_47 = arith.constant 0 : index
    %c0_48 = arith.constant 0 : index
    %c0_49 = arith.constant 0 : index
    %53 = vector.load %arg5[%c0_47, %c0_48, %c0_49] : memref<2x32x64xf32, #tpu.memory_space<vmem>>, vector<1x32x16xf32>
    %54 = vector.shape_cast %53 : vector<1x32x16xf32> to vector<32x16xf32>
    %55 = vector.shape_cast %52 : vector<32x16xf32> to vector<1x32x16xf32>
    tpu.vector_store %arg5[%c0_47, %c0_48, %c0_49], %55 {strides = array<i32>} : memref<2x32x64xf32, #tpu.memory_space<vmem>>, vector<1x32x16xf32>,
    %56 = vector.extract_strided_slice %51 {offsets = [0, 0], sizes = [32, 32], strides = [1, 1]} : vector<32x64xf32> to vector<32x32xf32>
    %c0_50 = arith.constant 0 : index
    %c0_51 = arith.constant 0 : index
    %c16 = arith.constant 16 : index
    %57 = vector.load %arg5[%c0_50, %c0_51, %c16] : memref<2x32x64xf32, #tpu.memory_space<vmem>>, vector<1x32x32xf32>
    %58 = vector.shape_cast %57 : vector<1x32x32xf32> to vector<32x32xf32>
    %59 = vector.shape_cast %56 : vector<32x32xf32> to vector<1x32x32xf32>
    tpu.vector_store %arg5[%c0_50, %c0_51, %c16], %59 {strides = array<i32>} : memref<2x32x64xf32, #tpu.memory_space<vmem>>, vector<1x32x32xf32>,
    %cst_52 = arith.constant 0.000000e+00 : f32
    %60 = vector.broadcast %cst_52 : f32 to vector<32x16xf32>
    %c0_53 = arith.constant 0 : index
    %c0_54 = arith.constant 0 : index
    %c48_55 = arith.constant 48 : index
    %61 = vector.load %arg5[%c0_53, %c0_54, %c48_55] : memref<2x32x64xf32, #tpu.memory_space<vmem>>, vector<1x32x16xf32>
    %62 = vector.shape_cast %61 : vector<1x32x16xf32> to vector<32x16xf32>
    %63 = vector.shape_cast %60 : vector<32x16xf32> to vector<1x32x16xf32>
    tpu.vector_store %arg5[%c0_53, %c0_54, %c48_55], %63 {strides = array<i32>} : memref<2x32x64xf32, #tpu.memory_space<vmem>>, vector<1x32x16xf32>,
    %cst_56 = arith.constant 0.000000e+00 : f32
    %64 = vector.broadcast %cst_56 : f32 to vector<32x16xf32>
    %c1_57 = arith.constant 1 : index
    %c0_58 = arith.constant 0 : index
    %c0_59 = arith.constant 0 : index
    %65 = vector.load %arg5[%c1_57, %c0_58, %c0_59] : memref<2x32x64xf32, #tpu.memory_space<vmem>>, vector<1x32x16xf32>
    %66 = vector.shape_cast %65 : vector<1x32x16xf32> to vector<32x16xf32>
    %67 = vector.shape_cast %64 : vector<32x16xf32> to vector<1x32x16xf32>
    tpu.vector_store %arg5[%c1_57, %c0_58, %c0_59], %67 {strides = array<i32>} : memref<2x32x64xf32, #tpu.memory_space<vmem>>, vector<1x32x16xf32>,
    %68 = vector.extract_strided_slice %51 {offsets = [0, 32], sizes = [32, 32], strides = [1, 1]} : vector<32x64xf32> to vector<32x32xf32>
    %c1_60 = arith.constant 1 : index
    %c0_61 = arith.constant 0 : index
    %c16_62 = arith.constant 16 : index
    %69 = vector.load %arg5[%c1_60, %c0_61, %c16_62] : memref<2x32x64xf32, #tpu.memory_space<vmem>>, vector<1x32x32xf32>
    %70 = vector.shape_cast %69 : vector<1x32x32xf32> to vector<32x32xf32>
    %71 = vector.shape_cast %68 : vector<32x32xf32> to vector<1x32x32xf32>
    tpu.vector_store %arg5[%c1_60, %c0_61, %c16_62], %71 {strides = array<i32>} : memref<2x32x64xf32, #tpu.memory_space<vmem>>, vector<1x32x32xf32>,
    %cst_63 = arith.constant 0.000000e+00 : f32
    %72 = vector.broadcast %cst_63 : f32 to vector<32x16xf32>
    %c1_64 = arith.constant 1 : index
    %c0_65 = arith.constant 0 : index
    %c48_66 = arith.constant 48 : index
    %73 = vector.load %arg5[%c1_64, %c0_65, %c48_66] : memref<2x32x64xf32, #tpu.memory_space<vmem>>, vector<1x32x16xf32>
    %74 = vector.shape_cast %73 : vector<1x32x16xf32> to vector<32x16xf32>
    %75 = vector.shape_cast %72 : vector<32x16xf32> to vector<1x32x16xf32>
    tpu.vector_store %arg5[%c1_64, %c0_65, %c48_66], %75 {strides = array<i32>} : memref<2x32x64xf32, #tpu.memory_space<vmem>>, vector<1x32x16xf32>,
    return
  }
  func.func @transform_0(%arg0: i32) -> (i32, i32, i32) {
    %c0_i32 = arith.constant 0 : i32
    %c0_i32_0 = arith.constant 0 : i32
    %c0_i32_1 = arith.constant 0 : i32
    %c0_i32_2 = arith.constant 0 : i32
    return %c0_i32, %c0_i32_0, %c0_i32_1 : i32, i32, i32
  }
  func.func @transform_1(%arg0: i32) -> (i32, i32) {
    %c0_i32 = arith.constant 0 : i32
    %c0_i32_0 = arith.constant 0 : i32
    return %arg0, %c0_i32 : i32, i32
  }
  func.func @transform_2(%arg0: i32) -> (i32, i32) {
    %c0_i32 = arith.constant 0 : i32
    %c0_i32_0 = arith.constant 0 : i32
    return %arg0, %c0_i32 : i32, i32
  }
  func.func @transform_3(%arg0: i32) -> (i32, i32) {
    %c0_i32 = arith.constant 0 : i32
    %c0_i32_0 = arith.constant 0 : i32
    return %arg0, %c0_i32 : i32, i32
  }
  func.func @transform_4(%arg0: i32) -> (i32, i32, i32) {
    %c0_i32 = arith.constant 0 : i32
    %c0_i32_0 = arith.constant 0 : i32
    %c0_i32_1 = arith.constant 0 : i32
    return %c0_i32, %arg0, %c0_i32_0 : i32, i32, i32
  }
}

</mosaic_0001>

<bundles_post_ra>
// kernel: tpu_custom_call.1
= control target key start
LH: loop header
LB: loop body
LE: loop exit
PB: predicated region body
PF: predicated region fallthrough
CT: control target
= control target key end

     0   :  { %9 = vsyncpa [#allocation4], 0  ;;  %s1303_s0 = inlined_call_operand.vmem [shape: bf16[2,24,35], index: 0, kind: input, shape index: {}]   ;;  %s1304_s1 = inlined_call_operand.vmem [shape: bf16[64,96], index: 1, kind: input, shape index: {}]   ;;  %s1305_s2 = inlined_call_operand.vmem [shape: f32[64,1], index: 2, kind: input, shape index: {}]   ;;  %s1306_s3 = inlined_call_operand.vmem [shape: f32[64,1], index: 3, kind: input, shape index: {}]   ;;  %s1307_s4 = inlined_call_operand.hbm [shape: f32[2,64,64], index: 4, kind: output, shape index: {}]  }
   0x1   :  { %11 = vsyncpa [#allocation4 + $0x1], 0  ;;  %s1036_s15 = smov 0   ;;  %s1038_s16 = smov 0  }
   0x2   :  { %s1040_s17 = smov 0   ;;  %s1042_s18 = smov 0  }
   0x3 LB: > { %s1057_s19 = sadd.s32 4294967295, %s991_s18   ;;  %s781_s20 = sadd.s32 4294967294, %s991_s18   ;;  %s991_s18 = sphi %s1042_s18, %s1313_s18   ;;  %s987_s17 = sphi %s1040_s17, %s1312_s17   ;;  %s983_s16 = sphi %s1038_s16, %s1311_s16   ;;  %s979_s15 = sphi %s1036_s15, %s1310_s15  }
   0x4   : > { %s1061_s21 = sadd.s32 1, %s991_s18   ;;  %s123_s22 = sadd.s32 1, %s987_s17 }
   0x5   : > { %s120_s23 = ssub.s32 %s991_s18, %s1061_s21  ;;  %p133_p0 = scmp.ne.s32.totalorder %s987_s17, %s983_s16 }
   0x6   : > { %p121_p1 = scmp.eq.s32.totalorder %s120_s23, 0  ;;  %p134_p2 = scmp.eq.s32.totalorder %s1057_s19, 1 }
   0x7   : > { %p139_p3 = scmp.ne.s32.totalorder %s983_s16, %s979_s15  ;;  %p140_p4 = scmp.eq.s32.totalorder %s781_s20, 1 }
   0x8   : > { %s1072_s24 = scalar_select %p121_p1, %s987_s17, %s123_s22  }
   0x9   : > { %p1074_p5 = por %p134_p2, %p133_p0  ;;  %p1078_p6 = por %p140_p4, %p139_p3 }
   0xa   : > { %p784_p7 = scmp.ge.s32.totalorder %s991_s18, 1  ;;  %p188_p8 = scmp.lt.s32.totalorder %s991_s18, 3 }
   0xc   : > { %p189_p9 = pnand %p784_p7, %p188_p8 }
   0xd   : > { %v931_v0 = vld [vmem:[%s1303_s0 + $0x14] ss:$0 sps:$4 sm:$0xff] (!%p189_p9)   ;;  %v932_v1 = vld [vmem:[%s1303_s0 + $0xc] sm:$0xff] (!%p189_p9)   ;;  %s993_s5 = smov (!%p189_p9), 32   ;;  %v934_v3 = vld [vmem:[%s1303_s0] ss:$0 sps:$4 sm:$0xff] (!%p189_p9)  }
   0xe   : > { %192 = sbr.rel (%p189_p9) target bundleno = 982 (0x3d6), region = 36  ;;  %275 = vrot.lane.b32.xlu1 (!%p189_p9), %v931_v0, %s993_s5  ;;  %273 = vrot.lane.b32.xlu0 (!%p189_p9), %v932_v1, %s993_s5  ;;  %v933_v2 = vld [vmem:[%s1303_s0 + $0xc] ss:$0 sps:$4 sm:$0xff] (!%p189_p9)   ;;  %v935_v4 = vld [vmem:[%s1303_s0 + $0x10] sm:$0xff] (!%p189_p9)   ;;  %s994_s12 = smov (!%p189_p9), 31   ;;  %vm259_vm0 = vcmask (!%p189_p9), 257024  }
   0xf   : > { %s995_s13 = smov (!%p189_p9), 127   ;;  %v936_v5 = vld [vmem:[%s1303_s0 + $0x4] sm:$0xff] (!%p189_p9)   ;;  %v937_v6 = vld [vmem:[%s1303_s0 + $0xc] sm:$0xff] (!%p189_p9)   ;;  %v939_v8 = vld [vmem:[%s1303_s0] ss:$0 sps:$4 sm:$0xff] (!%p189_p9)   ;;  %vm257_vm1 = vcmask (!%p189_p9), 261120  }
  0x10   : > { %v938_v7 = vld [vmem:[%s1303_s0] sm:$0xff] (!%p189_p9)   ;;  %v945_v9 = vld [vmem:[%s1303_s0 + $0x8] ss:$0 sps:$4 sm:$0xff] (!%p189_p9)   ;;  %s996_s7 = smov (!%p189_p9), 30   ;;  %s997_s8 = smov (!%p189_p9), 126   ;;  %v944_v15 = vld [vmem:[%s1303_s0 + $0x10] sm:$0xff] (!%p189_p9)  }
  0x11   : > { %v940_v10 = vld [vmem:[%s1303_s0 + $0x8] ss:$0 sps:$4 sm:$0xff] (!%p189_p9)   ;;  %v946_v11 = vld [vmem:[%s1303_s0] sm:$0xff] (!%p189_p9)   ;;  %260 = vst.msk [vmem:[#allocation2 + $0x8] sm:$0xf] (!%p189_p9), %vm259_vm0, %v945_v9  ;;  %s998_s14 = smov (!%p189_p9), 125  }
  0x12   : > { %314 = vrot.lane.b32.xlu1 (!%p189_p9), %v933_v2, %s994_s12  ;;  %294 = vrot.lane.b32.xlu0 (!%p189_p9), %v934_v3, %s995_s13  ;;  %258 = vst.msk [vmem:[#allocation2] sm:$0xff] (!%p189_p9), %vm257_vm1, %v946_v11  ;;  %v941_v12 = vld [vmem:[%s1303_s0 + $0xc] ss:$0 sps:$4 sm:$0xff] (!%p189_p9)   ;;  %v942_v13 = vld [vmem:[%s1303_s0 + $0x14] ss:$0 sps:$4 sm:$0xff] (!%p189_p9)   ;;  %s999_s29 = smov (!%p189_p9), 29  }
  0x13   : > { %v943_v14 = vld [vmem:[%s1303_s0 + $0x4] sm:$0xff] (!%p189_p9)   ;;  %vm419_vm2 = vcmask (!%p189_p9), 785408   ;;  %vm281_vm3 = vcmask (!%p189_p9), 519424   ;;  %vm279_vm4 = vcmask (!%p189_p9), 523520   ;;  %vm300_vm5 = vcmask (!%p189_p9), 261124   ;;  %s221_s27 = sand.u32 (!%p189_p9), 1, %s983_s16  }
  0x14   : > { %vm320_vm6 = vcmask (!%p189_p9), 523524   ;;  %vm475_vm7 = vcmask (!%p189_p9), 523264   ;;  %v1000_v2 = vmov (!%p189_p9), 0   ;;  %vm596_vm8 = vcmask (!%p189_p9), 130048   ;;  %s1002_s30 = smov (!%p189_p9), 16   ;;  %s1003_s5 = smov (!%p189_p9), 112  }
  0x15   : > { %929 = vset.pattern.permute.xlu1 %v1000_v2  ;;  %930 = vset.pattern.permute.xlu0 %v1000_v2  ;;  %vm617_vm9 = vcmask 392320   ;;  %vm622_vm10 = vcmask 523648   ;;  %s653_s6 = scalar_lea.sflag [#allocation4], %s221_s27 }
  0x16   : > { %316 = vrot.lane.b32.xlu1 %v935_v4, %s994_s12  ;;  %296 = vrot.lane.b32.xlu0 %v936_v5, %s995_s13  ;;  %s786_s13 = sshll.u32 %s1057_s19, 2 }
  0x17   : > { %p225_p10 = scmp.lt.s32.totalorder %s786_s13, 7 }
  0x19   : > { %s1315_s13 = smov (!%p225_p10, %s786_s13), 7 }
  0x1a   : > { %353 = vrot.lane.b32.xlu1 %v937_v6, %s996_s7  ;;  %334 = vrot.lane.b32.xlu0 %v938_v7, %s997_s8  ;;  %s787_s28 = sshll.u32 %s1315_s13, 2 }
  0x1b   : > { %s1141_s11 = scalar_lea.vmem %s1304_s1, %s787_s28  ;;  %s785_s28 = sshll.u32 %s221_s27, 6 }
  0x1c   : > { %v947_v16 = vld [vmem:[%s1141_s11] sm:$0xff]   ;;  %v948_v37 = vld [vmem:[%s1141_s11 + $0x8] sm:$0xff]  }
  0x1d   : > { %862 = vmatprep.mubr.msk.bf16.mxu0 %vm419_vm2, %v947_v16 }
  0x1e   : > { %372 = vrot.lane.b32.xlu1 %v939_v8, %s998_s14  ;;  %336 = vrot.lane.b32.xlu0 %v940_v10, %s997_s8 }
  0x22   : > { %391 = vrot.lane.b32.xlu1 %v941_v12, %s999_s29  ;;  %355 = vrot.lane.b32.xlu0 %v942_v13, %s996_s7  ;;  %s789_s7 = sshll.u32 %s1315_s13, 3 }
  0x23   : > { %s234_s20 = scalar_lea.vmem %s1305_s2, %s789_s7  ;;  %s240_s23 = scalar_lea.vmem %s1306_s3, %s789_s7 }
  0x26   : > { %374 = vrot.lane.b32.xlu0 %v943_v14, %s998_s14  ;;  %393 = vrot.lane.b32.xlu1 %v944_v15, %s999_s29  ;;  %v524_v15 = vld [vmem:[%s234_s20] sm:$0xff]  ;;  %s1203_s29 = scalar_lea.vmem [#allocation3], %s785_s28 }
  0x80   : > { %v276_v17 = vpop.permute.xlu1 %275  ;;  %v274_v18 = vpop.permute.xlu0 %273 }
  0x81   : > { %282 = vst.msk [vmem:[#allocation2 + $0x8] sm:$0xf] %vm281_vm3, %v276_v17  ;;  %v525_v17 = vld [vmem:[%s234_s20 + $0x8] sm:$0xff] }
  0x82   : > { %280 = vst.msk [vmem:[#allocation2] sm:$0xff] %vm279_vm4, %v274_v18 }
  0x84   : > { %v315_v19 = vpop.permute.xlu1 %314  ;;  %v295_v20 = vpop.permute.xlu0 %294 }
  0x85   : > { %301 = vst.msk [vmem:[#allocation2 + $0x8] sm:$0xf0] %vm300_vm5, %v295_v20  ;;  %v526_v20 = vld [vmem:[%s234_s20 + $0x10] sm:$0xff] }
  0x86   : > { %321 = vst.msk [vmem:[#allocation2 + $0x8] sm:$0xf0] %vm320_vm6, %v315_v19 }
  0x88   : > { %v317_v21 = vpop.permute.xlu1 %316  ;;  %v297_v22 = vpop.permute.xlu0 %296 }
  0x89   : > { %v403_v23 = vld [vmem:[#allocation2] sm:$0xff]  ;;  %302 = vst.msk [vmem:[#allocation2 + $0x10] sm:$0xff] %vm257_vm1, %v297_v22 }
  0x8a   : > { %850 = vmatprep.subr.bf16.mxu0 %v403_v23  ;;  %322 = vst.msk [vmem:[#allocation2 + $0x10] sm:$0xff] %vm279_vm4, %v317_v21 }
  0x8b   : > { %851 = vmatpush3.bf16.msra.mxu0 %v403_v23 }
  0x8c   : > { %v354_v24 = vpop.permute.xlu1 %353  ;;  %v335_v25 = vpop.permute.xlu0 %334 }
  0x8d   : > { %340 = vst.msk [vmem:[#allocation2 + $0x18] sm:$0xff] %vm257_vm1, %v335_v25  ;;  %v404_v26 = vld [vmem:[#allocation2 + $0x8] sm:$0xff] }
  0x8e   : > { %359 = vst.msk [vmem:[#allocation2 + $0x18] sm:$0xff] %vm279_vm4, %v354_v24  ;;  %852 = vmatprep.subr.bf16.mxu0 %v404_v26  ;;  %v527_v24 = vld [vmem:[%s234_s20 + $0x18] sm:$0xff] }
  0x8f   : > { %853 = vmatpush3.bf16.msra.mxu0 %v404_v26 }
  0x90   : > { %v373_v27 = vpop.permute.xlu1 %372  ;;  %v337_v28 = vpop.permute.xlu0 %336 }
  0x91   : > { %378 = vst.msk [vmem:[#allocation2 + $0x20] sm:$0xf0] %vm300_vm5, %v373_v27  ;;  %v405_v29 = vld [vmem:[#allocation2 + $0x10] sm:$0xff] }
  0x92   : > { %341 = vst.msk [vmem:[#allocation2 + $0x20] sm:$0xf] %vm259_vm0, %v337_v28  ;;  %854 = vmatprep.subr.bf16.mxu0 %v405_v29  ;;  %v534_v28 = vld [vmem:[%s240_s23 + $0x10] sm:$0xff] }
  0x93   : > { %855 = vmatpush3.bf16.msra.mxu0 %v405_v29 }
  0x94   : > { %v392_v30 = vpop.permute.xlu1 %391  ;;  %v356_v31 = vpop.permute.xlu0 %355 }
  0x95   : > { %397 = vst.msk [vmem:[#allocation2 + $0x20] sm:$0xf0] %vm320_vm6, %v392_v30  ;;  %v406_v32 = vld [vmem:[#allocation2 + $0x18] sm:$0xff] }
  0x96   : > { %360 = vst.msk [vmem:[#allocation2 + $0x20] sm:$0xf] %vm281_vm3, %v356_v31  ;;  %856 = vmatprep.subr.bf16.mxu0 %v406_v32  ;;  %v532_v31 = vld [vmem:[%s240_s23] sm:$0xff] }
  0x97   : > { %857 = vmatpush3.bf16.msra.mxu0 %v406_v32 }
  0x98   : > { %v375_v33 = vpop.permute.xlu0 %374  ;;  %v394_v34 = vpop.permute.xlu1 %393 }
  0x99   : > { %379 = vst.msk [vmem:[#allocation2 + $0x28] sm:$0xff] %vm257_vm1, %v375_v33 }
  0x9a   : > { %398 = vst.msk [vmem:[#allocation2 + $0x28] sm:$0xff] %vm279_vm4, %v394_v34  ;;  %v533_v34 = vld [vmem:[%s240_s23 + $0x8] sm:$0xff] }
  0x9d   : > { %v407_v35 = vld [vmem:[#allocation2 + $0x20] sm:$0xff] }
  0x9e   : > { %858 = vmatprep.subr.bf16.mxu0 %v407_v35 }
  0x9f   : > { %859 = vmatpush3.bf16.msra.mxu0 %v407_v35 }
  0xa1   : > { %v408_v36 = vld [vmem:[#allocation2 + $0x28] sm:$0xff] }
  0xa2   : > { %860 = vmatprep.subr.bf16.mxu0 %v408_v36 }
  0xa3   : > { %861 = vmatpush3.bf16.msra.mxu0 %v408_v36 }
  0xa6   : > { %863 = vmatmul.mubr.msk.bf16.vlgmr.msra.gmra.mrb[0].mxu0 %vm419_vm2, %v948_v37  ;;  %v535_v37 = vld [vmem:[%s240_s23 + $0x18] sm:$0xff] }
 0x179   : > { %v1161_v38 = vpop.f32.mrb[0].mxu0 }
 0x17a   : > { %v1163_v39 = vpop.f32.mrb[1].mxu0  ;;  %v482_v44 = vsel %vm475_vm7, %v1161_v38, 0.0 }
 0x17b   : > { %v1165_v40 = vpop.f32.mrb[2].mxu0  ;;  %v476_v41 = vsel %vm475_vm7, %v1163_v39, 0.0 }
 0x17c   : > { %477 = vadd.xlane.f32.xlu0 %v476_v41  ;;  %v1169_v42 = vpop.f32.mrb[3].mxu0  ;;  %v485_v45 = vsel %vm475_vm7, %v1165_v40, 0.0 }
 0x17d   : > { %v479_v43 = vsel %vm475_vm7, %v1169_v42, 0.0 }
 0x17e   : > { %480 = vadd.xlane.f32.xlu1 %v479_v43 }
 0x180   : > { %483 = vadd.xlane.f32.xlu0 %v482_v44  ;;  %v1001_v44 = vmov 0.0  }
 0x181   : > { %599 = vst.msk [vmem:[%s1203_s29 + $0x10] sm:$0xff] %vm596_vm8, %v1001_v44  ;;  %597 = vst.msk [vmem:[%s1203_s29] sm:$0xff] %vm596_vm8, %v1001_v44 }
 0x182   : > { %598 = vst.msk [vmem:[%s1203_s29 + $0x8] sm:$0xff] %vm596_vm8, %v1001_v44  ;;  %600 = vst.msk [vmem:[%s1203_s29 + $0x18] sm:$0xff] %vm596_vm8, %v1001_v44 }
 0x183   : > { %824 = vst.msk [vmem:[%s1203_s29 + $0x20] sm:$0xff] %vm596_vm8, %v1001_v44  ;;  %825 = vst.msk [vmem:[%s1203_s29 + $0x28] sm:$0xff] %vm596_vm8, %v1001_v44 }
 0x184   : > { %486 = vadd.xlane.f32.xlu0 %v485_v45  ;;  %826 = vst.msk [vmem:[%s1203_s29 + $0x30] sm:$0xff] %vm596_vm8, %v1001_v44  ;;  %827 = vst.msk [vmem:[%s1203_s29 + $0x38] sm:$0xff] %vm596_vm8, %v1001_v44 }
 0x209   : > { %v478_v46 = vpop.xlane.xlu0 %477 }
 0x20a   : > { %v1177_v47 = vmul.f32 0.015625, %v478_v46 }
 0x20b   : > { %v481_v48 = vpop.xlane.xlu1 %480 }
 0x20c   : > { %v492_v49 = vsub.f32 %v1163_v39, %v1177_v47  ;;  %v1181_v50 = vmul.f32 0.015625, %v481_v48 }
 0x20d   : > { %v484_v51 = vpop.xlane.xlu0 %483 }
 0x20e   : > { %v493_v52 = vsub.f32 %v1169_v42, %v1181_v50  ;;  %v490_v53 = vmul.f32 0.015625, %v484_v51  ;;  %v496_v54 = vmul.f32 %v492_v49, %v492_v49 }
 0x210   : > { %v494_v55 = vsub.f32 %v1161_v38, %v490_v53  ;;  %v500_v56 = vsel %vm475_vm7, %v496_v54, 0.0  ;;  %v497_v57 = vmul.f32 %v493_v52, %v493_v52 }
 0x211   : > { %v487_v58 = vpop.xlane.xlu0 %486  ;;  %501 = vadd.xlane.f32.xlu1 %v500_v56 }
 0x212   : > { %v491_v59 = vmul.f32 0.015625, %v487_v58  ;;  %v503_v60 = vsel %vm475_vm7, %v497_v57, 0.0  ;;  %v498_v61 = vmul.f32 %v494_v55, %v494_v55 }
 0x213   : > { %504 = vadd.xlane.f32.xlu0 %v503_v60 }
 0x214   : > { %v495_v62 = vsub.f32 %v1165_v40, %v491_v59  ;;  %v506_v63 = vsel %vm475_vm7, %v498_v61, 0.0 }
 0x215   : > { %507 = vadd.xlane.f32.xlu1 %v506_v63 }
 0x216   : > { %v499_v0 = vmul.f32 %v495_v62, %v495_v62 }
 0x218   : > { %v509_v1 = vsel %vm475_vm7, %v499_v0, 0.0 }
 0x219   : > { %510 = vadd.xlane.f32.xlu0 %v509_v1 }
 0x29e   : > { %v502_v3 = vpop.xlane.xlu1 %501 }
 0x29f   : > { %v512_v4 = vmul.f32 0.015625, %v502_v3 }
 0x2a0   : > { %v505_v5 = vpop.xlane.xlu0 %504 }
 0x2a1   : > { %v516_v6 = vadd.f32 1e-05, %v512_v4  ;;  %v513_v7 = vmul.f32 0.015625, %v505_v5 }
 0x2a2   : > { %v508_v8 = vpop.xlane.xlu1 %507 }
 0x2a3   : > { %949 = vrsqrt.f32 %v516_v6  ;;  %v517_v9 = vadd.f32 1e-05, %v513_v7  ;;  %v514_v10 = vmul.f32 0.015625, %v508_v8 }
 0x2a5   : > { %951 = vrsqrt.f32 %v517_v9  ;;  %v518_v11 = vadd.f32 1e-05, %v514_v10 }
 0x2a6   : > { %v511_v12 = vpop.xlane.xlu0 %510 }
 0x2a7   : > { %953 = vrsqrt.f32 %v518_v11  ;;  %v515_v13 = vmul.f32 0.015625, %v511_v12 }
 0x2a9   : > { %v519_v14 = vadd.f32 1e-05, %v515_v13 }
 0x2ab   : > { %955 = vrsqrt.f32 %v519_v14 }
 0x2ad   : > { %v950_v16 = vpop.eup %949 }
 0x2ae   : > { %v528_v18 = vmul.f32 %v950_v16, %v524_v15 }
 0x2af   : > { %v952_v19 = vpop.eup %951 }
 0x2b0   : > { %546 = vperm.xlu1 %929, %v528_v18   ;;  %v529_v21 = vmul.f32 %v952_v19, %v525_v17  ;;  %v536_v30 = vmul.f32 %v528_v18, %v1177_v47 }
 0x2b1   : > { %v954_v22 = vpop.eup %953 }
 0x2b2   : > { %551 = vperm.xlu0 %930, %v529_v21   ;;  %v530_v23 = vmul.f32 %v954_v22, %v526_v20  ;;  %v540_v32 = vsub.f32 %v532_v31, %v536_v30  ;;  %v537_v33 = vmul.f32 %v529_v21, %v1181_v50 }
 0x2b4   : > { %556 = vperm.xlu1 %929, %v530_v23   ;;  %v538_v27 = vmul.f32 %v530_v23, %v490_v53  ;;  %v541_v35 = vsub.f32 %v533_v34, %v537_v33 }
 0x2b5   : > { %v956_v25 = vpop.eup %955 }
 0x2b6   : > { %v531_v26 = vmul.f32 %v956_v25, %v527_v24  ;;  %v542_v29 = vsub.f32 %v534_v28, %v538_v27 }
 0x2b8   : > { %561 = vperm.xlu1 %929, %v531_v26   ;;  %v539_v36 = vmul.f32 %v531_v26, %v491_v59 }
 0x2ba   : > { %v543_v41 = vsub.f32 %v535_v37, %v539_v36 }
 0x2bc   : > { %580 = vperm.xlu1 %929, %v542_v29  }
 0x2c0   : > { %570 = vperm.xlu1 %929, %v540_v32  }
 0x2c4   : > { %575 = vperm.xlu1 %929, %v541_v35  }
 0x2c8   : > { %585 = vperm.xlu1 %929, %v543_v41  }
 0x32f   : > { %v547_v43 = vpop.permute.xlu1 %546 }
 0x330   : > { %v564_v50 = vmul.f32 %v547_v43, %v1163_v39 }
 0x331   : > { %v552_v56 = vpop.permute.xlu0 %551 }
 0x332   : > { %v565_v58 = vmul.f32 %v552_v56, %v1169_v42 }
 0x333   : > { %v557_v45 = vpop.permute.xlu1 %556 }
 0x334   : > { %v566_v47 = vmul.f32 %v1161_v38, %v557_v45 }
 0x337   : > { %v562_v46 = vpop.permute.xlu1 %561 }
 0x338   : > { %v567_v57 = vmul.f32 %v1165_v40, %v562_v46 }
 0x33b   : > { %v581_v48 = vpop.permute.xlu1 %580 }
 0x33c   : > { %v590_v49 = vadd.f32 %v581_v48, %v566_v47 }
 0x33e   : > { %v594_v51 = vmax.f32 %v590_v49, 0.0 }
 0x33f   : > { %v571_v52 = vpop.permute.xlu1 %570 }
 0x340   : > { %v588_v53 = vadd.f32 %v571_v52, %v564_v50  ;;  %609 = vrot.lane.b32.xlu0 %v594_v51, %s1002_s30 }
 0x342   : > { %v592_v54 = vmax.f32 %v588_v53, 0.0 }
 0x343   : > { %v576_v55 = vpop.permute.xlu1 %575 }
 0x344   : > { %632 = vrot.lane.b32.xlu0 %v592_v54, %s1003_s5  ;;  %605 = vrot.lane.b32.xlu1 %v592_v54, %s1002_s30  ;;  %v589_v39 = vadd.f32 %v576_v55, %v565_v58 }
 0x346   : > { %v593_v61 = vmax.f32 %v589_v39, 0.0 }
 0x347   : > { %v586_v38 = vpop.permute.xlu1 %585 }
 0x348   : > { %v591_v59 = vadd.f32 %v586_v38, %v567_v57  ;;  %636 = vrot.lane.b32.xlu0 %v594_v51, %s1003_s5 }
 0x34a   : > { %v595_v60 = vmax.f32 %v591_v59, 0.0 }
 0x34c   : > { %611 = vrot.lane.b32.xlu1 %v595_v60, %s1002_s30 }
 0x350   : > { %607 = vrot.lane.b32.xlu1 %v593_v61, %s1002_s30 }
 0x354   : > { %634 = vrot.lane.b32.xlu1 %v593_v61, %s1003_s5 }
 0x358   : > { %638 = vrot.lane.b32.xlu1 %v595_v60, %s1003_s5 }
 0x3b2   : > { %v610_v40 = vpop.permute.xlu0 %609 }
 0x3b3   : > { %620 = vst.msk [vmem:[%s1203_s29 + $0x10] sm:$0xff] %vm617_vm9, %v610_v40 }
 0x3b4   : > { %625 = vst.msk [vmem:[%s1203_s29 + $0x10] sm:$0xff] %vm622_vm10, %v1001_v44 }
 0x3b6   : > { %v633_v42 = vpop.permute.xlu0 %632  ;;  %v606_v62 = vpop.permute.xlu1 %605 }
 0x3b7   : > { %828 = vst.msk [vmem:[%s1203_s29 + $0x20] sm:$0xff] %vm617_vm9, %v633_v42  ;;  %618 = vst.msk [vmem:[%s1203_s29] sm:$0xff] %vm617_vm9, %v606_v62 }
 0x3b8   : > { %832 = vst.msk [vmem:[%s1203_s29 + $0x20] sm:$0xff] %vm622_vm10, %v1001_v44  ;;  %623 = vst.msk [vmem:[%s1203_s29] sm:$0xff] %vm622_vm10, %v1001_v44 }
 0x3ba   : > { %v637_v63 = vpop.permute.xlu0 %636 }
 0x3bb   : > { %830 = vst.msk [vmem:[%s1203_s29 + $0x30] sm:$0xff] %vm617_vm9, %v637_v63 }
 0x3bc   : > { %834 = vst.msk [vmem:[%s1203_s29 + $0x30] sm:$0xff] %vm622_vm10, %v1001_v44 }
 0x3be   : > { %v612_v0 = vpop.permute.xlu1 %611 }
 0x3bf   : > { %621 = vst.msk [vmem:[%s1203_s29 + $0x18] sm:$0xff] %vm617_vm9, %v612_v0 }
 0x3c0   : > { %626 = vst.msk [vmem:[%s1203_s29 + $0x18] sm:$0xff] %vm622_vm10, %v1001_v44 }
 0x3c2   : > { %v608_v1 = vpop.permute.xlu1 %607 }
 0x3c3   : > { %619 = vst.msk [vmem:[%s1203_s29 + $0x8] sm:$0xff] %vm617_vm9, %v608_v1 }
 0x3c4   : > { %624 = vst.msk [vmem:[%s1203_s29 + $0x8] sm:$0xff] %vm622_vm10, %v1001_v44 }
 0x3c6   : > { %v635_v2 = vpop.permute.xlu1 %634 }
 0x3c7   : > { %829 = vst.msk [vmem:[%s1203_s29 + $0x28] sm:$0xff] %vm617_vm9, %v635_v2 }
 0x3c8   : > { %833 = vst.msk [vmem:[%s1203_s29 + $0x28] sm:$0xff] %vm622_vm10, %v1001_v44 }
 0x3ca   : > { %v639_v3 = vpop.permute.xlu1 %638 }
 0x3cb   : > { %831 = vst.msk [vmem:[%s1203_s29 + $0x38] sm:$0xff] %vm617_vm9, %v639_v3 }
 0x3cc   : > { %835 = vst.msk [vmem:[%s1203_s29 + $0x38] sm:$0xff] %vm622_vm10, %v1001_v44 }
 0x3cd   : > { %s841_s8 = sshll.u32 %s1057_s19, 9  ;;  %s682_s9 = sshll.u32 %s1203_s29, 4  ;;  %s683_s9 = int_to_ptr.vmem [resolvable:$true] %s682_s9 }
 0x3ce   : > { %s665_s7 = scalar_lea.hbm %s1307_s4, %s841_s8  ;;  %s1004_s12 = smov 512  }
 0x3cf   : > { %866 = sst [smem:[#allocation6]] (%p1074_p5), %s1004_s12  ;;  %s1005_s14 = smov 1024  }
 0x3d0   : > { %867 = sst [smem:[#allocation6 + $0x1]] (%p1074_p5), %s1005_s14  ;;  %s1006_s20 = smov 4  }
 0x3d1   : > { %868 = sst [smem:[#allocation6 + $0x2]] (%p1074_p5), %s1006_s20  ;;  %s1007_s13 = smov 128  }
 0x3d2   : > { %869 = sst [smem:[#allocation6 + $0x3]] (%p1074_p5), %s1007_s13  ;;  %s1008_s19 = smov 8  }
 0x3d3   : > { %870 = sst [smem:[#allocation6 + $0x4]] (%p1074_p5), %s1007_s13  ;;  %s1009_s22 = smov [#allocation5]  }
 0x3d4   : > { %871 = sst [smem:[#allocation6 + $0x5]] (%p1074_p5), %s1008_s19  ;;  %s1010_s23 = smov 0  }
 0x3d5   : > { %872 = dma.general (%p1074_p5), %s683_s9, 1024, %s665_s7, %s653_s6, %s1009_s22, [#allocation6], %s1010_s23, 0  }
 0x3d6 PF: > { %p878_p11 = scmp.ge.s32.totalorder %s991_s18, 2  ;;  %s710_s27 = sand.u32 1, %s979_s15  }
 0x3d7   : > { %s711_s28 = scalar_lea.sflag [#allocation4], %s710_s27 }
 0x3d8   : > { %p875_p12 = pnand %p878_p11, %p1078_p6 }
 0x3da   : > { %974 = dma.done.wait (!%p875_p12), %s711_s28, 1024  }
 0x3db   : > { %976 = vsyncadd (!%p875_p12), %s711_s28, 4294966272  ;;  %p14_p13 = scmp.ge.s32.totalorder %s1061_s21, 4   ;;  %s1310_s15 = smov %s983_s16 }
 0x3dc   : > { %s1311_s16 = smov %s987_s17  ;;  %s1312_s17 = smov %s1072_s24 }
 0x3dd   : > { %s1313_s18 = smov %s1061_s21  ;;  %16 = sbr.rel (!%p14_p13) target bundleno = 3 (0x3), region = 84 }
 0x3e4   :  { %716 = vsyncpa [#allocation4], 1 }
 0x3e5   :  { %718 = vsyncpa [#allocation4 + $0x1], 1 }

</bundles_post_ra>
